<compile_context>
chip_gen: v6e
topology: v6e:2x2x1
jax: 0.10.0
libtpu: 0.0.40
codegen_flags: <defaults>
</compile_context>

<pallas_src>
import jax
import jax.numpy as jnp
from jax.experimental import pallas as pl
from jax.experimental.pallas import tpu as pltpu


def _round_up(n, m):
    return ((n + m - 1) // m) * m


def mlp_kernel(x_ref, w1_ref, b1_ref, w2_ref, b2_ref, w3_ref, b3_ref, o_ref):
    # Layer 1: Linear(896 -> 256) + ReLU   (padded from 784 -> 200)
    h1 = jnp.dot(x_ref[...], w1_ref[...], preferred_element_type=jnp.float32)
    h1 = jnp.maximum(h1 + b1_ref[...], 0.0)
    # Layer 2: Linear(256 -> 256) + ReLU   (padded from 200 -> 200)
    h2 = jnp.dot(h1.astype(w2_ref.dtype), w2_ref[...],
                 preferred_element_type=jnp.float32)
    h2 = jnp.maximum(h2 + b2_ref[...], 0.0)
    # Layer 3: Linear(256 -> 128) + ReLU   (padded from 200 -> 10)
    h3 = jnp.dot(h2.astype(w3_ref.dtype), w3_ref[...],
                 preferred_element_type=jnp.float32)
    o_ref[...] = jnp.maximum(h3 + b3_ref[...], 0.0).astype(o_ref.dtype)


def mlp_forward(x, w1, b1, w2, b2, w3, b3, *, tb_max=256,
                weight_dtype=jnp.bfloat16):
    """relu(relu(relu(x@w1+b1)@w2+b2)@w3+b3), Pallas-fused and batch-tiled."""
    B, K = x.shape
    H1 = w1.shape[1]
    H2 = w2.shape[1]
    O = w3.shape[1]

    # Lane-aligned padded sizes (zero padding is transparent through Linear+ReLU).
    Kp = _round_up(K, 128)     # 784 -> 896
    H1p = _round_up(H1, 128)   # 200 -> 256
    H2p = _round_up(H2, 128)   # 200 -> 256
    Op = _round_up(O, 128)     # 10  -> 128

    # Batch tile: multiple of 8 (sublane), capped at tb_max; pad batch up to a multiple.
    TB = min(tb_max, _round_up(B, 8))
    Bp = _round_up(B, TB)

    def pad2(a, r, c, dtype):
        return jnp.pad(a, ((0, r - a.shape[0]), (0, c - a.shape[1]))).astype(dtype)

    xp = pad2(x, Bp, Kp, weight_dtype)
    w1p = pad2(w1, Kp, H1p, weight_dtype)
    w2p = pad2(w2, H1p, H2p, weight_dtype)
    w3p = pad2(w3, H2p, Op, weight_dtype)
    b1p = pad2(b1, 1, H1p, jnp.float32)
    b2p = pad2(b2, 1, H2p, jnp.float32)
    b3p = pad2(b3, 1, Op, jnp.float32)

    grid = (Bp // TB,)
    wbytes = lambda a: a.size * a.dtype.itemsize
    cost = pl.CostEstimate(
        flops=2 * Bp * (Kp * H1p + H1p * H2p + H2p * Op),
        transcendentals=0,
        bytes_accessed=(wbytes(xp) + wbytes(w1p) + wbytes(w2p) + wbytes(w3p)
                        + wbytes(b1p) + wbytes(b2p) + wbytes(b3p)
                        + Bp * Op * 4),
    )

    out = pl.pallas_call(
        mlp_kernel,
        out_shape=jax.ShapeDtypeStruct((Bp, Op), jnp.float32),
        grid_spec=pltpu.PrefetchScalarGridSpec(
            num_scalar_prefetch=0,
            grid=grid,
            in_specs=[
                # Activation tile: streamed / pipelined over the batch grid.
                pl.BlockSpec((TB, Kp), lambda i: (i, 0)),
                # Weights & biases: same block every step -> DMA'd once, VMEM-resident.
                pl.BlockSpec((Kp, H1p), lambda i: (0, 0)),
                pl.BlockSpec((1, H1p), lambda i: (0, 0)),
                pl.BlockSpec((H1p, H2p), lambda i: (0, 0)),
                pl.BlockSpec((1, H2p), lambda i: (0, 0)),
                pl.BlockSpec((H2p, Op), lambda i: (0, 0)),
                pl.BlockSpec((1, Op), lambda i: (0, 0)),
            ],
            out_specs=pl.BlockSpec((TB, Op), lambda i: (i, 0)),
        ),
        compiler_params=pltpu.CompilerParams(
            dimension_semantics=("parallel",),  # megacore sharding on v7x; no-op on v5e/v6e
        ),
        cost_estimate=cost,
    )(xp, w1p, b1p, w2p, b2p, w3p, b3p)

    # Strip batch and lane padding (padded output columns are exactly zero).
    return out[:B, :O]


def init_params(key):
    k1, k2, k3, k4, k5, k6 = jax.random.split(key, 6)

    # PyTorch-like uniform(-1/sqrt(fan_in), 1/sqrt(fan_in)) init, (in, out) layout.
    def lin(kw, kb, fan_in, fan_out):
        bound = 1.0 / jnp.sqrt(fan_in)
        w = jax.random.uniform(kw, (fan_in, fan_out), jnp.float32, -bound, bound)
        b = jax.random.uniform(kb, (1, fan_out), jnp.float32, -bound, bound)
        return w, b

    w1, b1 = lin(k1, k2, 784, 200)
    w2, b2 = lin(k3, k4, 200, 200)
    w3, b3 = lin(k5, k6, 200, 10)
    return w1, b1, w2, b2, w3, b3


if __name__ == "__main__":
    key = jax.random.PRNGKey(0)
    kx, kp = jax.random.split(key)

    batch = 8
    x = jax.random.normal(kx, (batch, 784), dtype=jnp.float32)
    w1, b1, w2, b2, w3, b3 = init_params(kp)

    out = mlp_forward(x, w1, b1, w2, b2, w3, b3)
    out = jax.block_until_ready(out)

    # Pure-JAX f32 reference (kernel uses bf16 weights/activations with f32 accumulation,
    # so compare with a bf16-appropriate tolerance).
    def ref(x):
        h = jnp.maximum(x @ w1 + b1, 0.0)
        h = jnp.maximum(h @ w2 + b2, 0.0)
        return jnp.maximum(h @ w3 + b3, 0.0)

    expected = ref(x)
    assert out.shape == (batch, 10), out.shape
    assert jnp.allclose(out, expected, atol=5e-2, rtol=5e-2), (
        float(jnp.max(jnp.abs(out - expected))))

    print("KERNEL_OK")
</pallas_src>

<mosaic_0001>
module attributes {stable_mosaic.version = 11 : i64} {
  func.func @mlp_kernel(%arg0: i32, %arg1: memref<8x896xbf16, #tpu.memory_space<vmem>>, %arg2: memref<896x256xbf16, #tpu.memory_space<vmem>>, %arg3: memref<1x256xf32, #tpu.memory_space<vmem>>, %arg4: memref<256x256xbf16, #tpu.memory_space<vmem>>, %arg5: memref<1x256xf32, #tpu.memory_space<vmem>>, %arg6: memref<256x128xbf16, #tpu.memory_space<vmem>>, %arg7: memref<1x128xf32, #tpu.memory_space<vmem>>, %arg8: memref<8x128xf32, #tpu.memory_space<vmem>>) attributes {dimension_semantics = [#tpu.dimension_semantics<parallel>], iteration_bounds = array<i64: 1>, scalar_prefetch = 0 : i64, scratch_operands = 0 : i64, tpu.core_type = #tpu.core_type<tc>, window_params = [{transform_indices = @transform_0, window_bounds = array<i64: 8, 896>}, {pipeline_mode = #tpu.pipeline_mode<synchronous>, transform_indices = @transform_1, window_bounds = array<i64: 896, 256>}, {pipeline_mode = #tpu.pipeline_mode<synchronous>, transform_indices = @transform_2, window_bounds = array<i64: 1, 256>}, {pipeline_mode = #tpu.pipeline_mode<synchronous>, transform_indices = @transform_3, window_bounds = array<i64: 256, 256>}, {pipeline_mode = #tpu.pipeline_mode<synchronous>, transform_indices = @transform_4, window_bounds = array<i64: 1, 256>}, {pipeline_mode = #tpu.pipeline_mode<synchronous>, transform_indices = @transform_5, window_bounds = array<i64: 256, 128>}, {pipeline_mode = #tpu.pipeline_mode<synchronous>, transform_indices = @transform_6, window_bounds = array<i64: 1, 128>}, {transform_indices = @transform_7, window_bounds = array<i64: 8, 128>}]} {
    %c0 = arith.constant 0 : index
    %c0_0 = arith.constant 0 : index
    %0 = vector.load %arg1[%c0, %c0_0] : memref<8x896xbf16, #tpu.memory_space<vmem>>, vector<8x896xbf16>
    %c0_1 = arith.constant 0 : index
    %c0_2 = arith.constant 0 : index
    %1 = vector.load %arg2[%c0_1, %c0_2] : memref<896x256xbf16, #tpu.memory_space<vmem>>, vector<896x256xbf16>
    %cst = arith.constant dense<0.000000e+00> : vector<8x256xf32>
    %2 = tpu.matmul %0, %1, %cst {dimension_numbers = #tpu.dot_dimension_numbers<[1], [0], [0], [1], [0, 0, 1, 1], [], []>} : vector<8x896xbf16>, vector<896x256xbf16>, vector<8x256xf32> -> vector<8x256xf32>
    %c0_3 = arith.constant 0 : index
    %c0_4 = arith.constant 0 : index
    %3 = vector.load %arg3[%c0_3, %c0_4] : memref<1x256xf32, #tpu.memory_space<vmem>>, vector<1x256xf32>
    %4 = vector.broadcast %3 : vector<1x256xf32> to vector<8x256xf32>
    %5 = arith.addf %2, %4 : vector<8x256xf32>
    %cst_5 = arith.constant 0.000000e+00 : f32
    %6 = vector.broadcast %cst_5 : f32 to vector<8x256xf32>
    %7 = arith.maximumf %5, %6 : vector<8x256xf32>
    %8 = arith.truncf %7 : vector<8x256xf32> to vector<8x256xbf16>
    %c0_6 = arith.constant 0 : index
    %c0_7 = arith.constant 0 : index
    %9 = vector.load %arg4[%c0_6, %c0_7] : memref<256x256xbf16, #tpu.memory_space<vmem>>, vector<256x256xbf16>
    %cst_8 = arith.constant dense<0.000000e+00> : vector<8x256xf32>
    %10 = tpu.matmul %8, %9, %cst_8 {dimension_numbers = #tpu.dot_dimension_numbers<[1], [0], [0], [1], [0, 0, 1, 1], [], []>} : vector<8x256xbf16>, vector<256x256xbf16>, vector<8x256xf32> -> vector<8x256xf32>
    %c0_9 = arith.constant 0 : index
    %c0_10 = arith.constant 0 : index
    %11 = vector.load %arg5[%c0_9, %c0_10] : memref<1x256xf32, #tpu.memory_space<vmem>>, vector<1x256xf32>
    %12 = vector.broadcast %11 : vector<1x256xf32> to vector<8x256xf32>
    %13 = arith.addf %10, %12 : vector<8x256xf32>
    %cst_11 = arith.constant 0.000000e+00 : f32
    %14 = vector.broadcast %cst_11 : f32 to vector<8x256xf32>
    %15 = arith.maximumf %13, %14 : vector<8x256xf32>
    %16 = arith.truncf %15 : vector<8x256xf32> to vector<8x256xbf16>
    %c0_12 = arith.constant 0 : index
    %c0_13 = arith.constant 0 : index
    %17 = vector.load %arg6[%c0_12, %c0_13] : memref<256x128xbf16, #tpu.memory_space<vmem>>, vector<256x128xbf16>
    %cst_14 = arith.constant dense<0.000000e+00> : vector<8x128xf32>
    %18 = tpu.matmul %16, %17, %cst_14 {dimension_numbers = #tpu.dot_dimension_numbers<[1], [0], [0], [1], [0, 0, 1, 1], [], []>} : vector<8x256xbf16>, vector<256x128xbf16>, vector<8x128xf32> -> vector<8x128xf32>
    %c0_15 = arith.constant 0 : index
    %c0_16 = arith.constant 0 : index
    %19 = vector.load %arg7[%c0_15, %c0_16] : memref<1x128xf32, #tpu.memory_space<vmem>>, vector<1x128xf32>
    %20 = vector.broadcast %19 : vector<1x128xf32> to vector<8x128xf32>
    %21 = arith.addf %18, %20 : vector<8x128xf32>
    %cst_17 = arith.constant 0.000000e+00 : f32
    %22 = vector.broadcast %cst_17 : f32 to vector<8x128xf32>
    %23 = arith.maximumf %21, %22 : vector<8x128xf32>
    %c0_18 = arith.constant 0 : index
    %c0_19 = arith.constant 0 : index
    %24 = vector.load %arg8[%c0_18, %c0_19] : memref<8x128xf32, #tpu.memory_space<vmem>>, vector<8x128xf32>
    tpu.vector_store %arg8[%c0_18, %c0_19], %23 {strides = array<i32>} : memref<8x128xf32, #tpu.memory_space<vmem>>, vector<8x128xf32>,
    return
  }
  func.func @transform_0(%arg0: i32) -> (i32, i32) {
    %c0_i32 = arith.constant 0 : i32
    %c0_i32_0 = arith.constant 0 : i32
    return %arg0, %c0_i32 : i32, i32
  }
  func.func @transform_1(%arg0: i32) -> (i32, i32) {
    %c0_i32 = arith.constant 0 : i32
    %c0_i32_0 = arith.constant 0 : i32
    %c0_i32_1 = arith.constant 0 : i32
    return %c0_i32, %c0_i32_0 : i32, i32
  }
  func.func @transform_2(%arg0: i32) -> (i32, i32) {
    %c0_i32 = arith.constant 0 : i32
    %c0_i32_0 = arith.constant 0 : i32
    %c0_i32_1 = arith.constant 0 : i32
    return %c0_i32, %c0_i32_0 : i32, i32
  }
  func.func @transform_3(%arg0: i32) -> (i32, i32) {
    %c0_i32 = arith.constant 0 : i32
    %c0_i32_0 = arith.constant 0 : i32
    %c0_i32_1 = arith.constant 0 : i32
    return %c0_i32, %c0_i32_0 : i32, i32
  }
  func.func @transform_4(%arg0: i32) -> (i32, i32) {
    %c0_i32 = arith.constant 0 : i32
    %c0_i32_0 = arith.constant 0 : i32
    %c0_i32_1 = arith.constant 0 : i32
    return %c0_i32, %c0_i32_0 : i32, i32
  }
  func.func @transform_5(%arg0: i32) -> (i32, i32) {
    %c0_i32 = arith.constant 0 : i32
    %c0_i32_0 = arith.constant 0 : i32
    %c0_i32_1 = arith.constant 0 : i32
    return %c0_i32, %c0_i32_0 : i32, i32
  }
  func.func @transform_6(%arg0: i32) -> (i32, i32) {
    %c0_i32 = arith.constant 0 : i32
    %c0_i32_0 = arith.constant 0 : i32
    %c0_i32_1 = arith.constant 0 : i32
    return %c0_i32, %c0_i32_0 : i32, i32
  }
  func.func @transform_7(%arg0: i32) -> (i32, i32) {
    %c0_i32 = arith.constant 0 : i32
    %c0_i32_0 = arith.constant 0 : i32
    return %arg0, %c0_i32 : i32, i32
  }
}

</mosaic_0001>

<bundles_post_ra>
// kernel: tpu_custom_call.1
= control target key start
LH: loop header
LB: loop body
LE: loop exit
PB: predicated region body
PF: predicated region fallthrough
CT: control target
= control target key end

     0   :  { %12 = vsyncpa [#allocation3], 0  ;;  %s2032_s0 = inlined_call_operand.hbm [shape: bf16[8,896], index: 0, kind: input, shape index: {}]   ;;  %s2033_s1 = inlined_call_operand.hbm [shape: bf16[896,256], index: 1, kind: input, shape index: {}]   ;;  %s2034_s2 = inlined_call_operand.vmem [shape: f32[1,256], index: 2, kind: input, shape index: {}]   ;;  %s2035_s3 = inlined_call_operand.hbm [shape: bf16[256,256], index: 3, kind: input, shape index: {}]   ;;  %s2036_s4 = inlined_call_operand.vmem [shape: f32[1,256], index: 4, kind: input, shape index: {}]   ;;  %s2037_s5 = inlined_call_operand.hbm [shape: bf16[256,128], index: 5, kind: input, shape index: {}]   ;;  %s2038_s6 = inlined_call_operand.vmem [shape: f32[1,128], index: 6, kind: input, shape index: {}]   ;;  %s2039_s7 = inlined_call_operand.hbm [shape: f32[8,128], index: 7, kind: output, shape index: {}]  }
   0x1   :  { %13 = vsyncpa [#allocation6], 0 }
   0x2   :  { %14 = vsyncpa [#allocation9], 0 }
   0x3   :  { %15 = vsyncpa [#allocation4], 0  ;;  %s1952_s24 = smov [#allocation5]  }
   0x4   :  { %s31_s25 = sshll.u32 %s1952_s24, 4  ;;  %s32_s25 = int_to_ptr.vmem [resolvable:$true] %s31_s25 }
   0x5   :  { %s1852_s26 = scalar_lea.vmem %s32_s25, 14336  ;;  %p1857_p1 = scmp.lt.s32.totalorder %s32_s25, %s32_s25 }
   0x6   :  { %p1853_p0 = scmp.ne.s32.totalorder %s32_s25, %s1852_s26  ;;  %p1858_p2 = scmp.lt.s32.totalorder %s1852_s26, %s1852_s26 }
   0x8   :  { %p1859_p3 = por %p1858_p2, %p1857_p1 }
   0xa   :  { %p1860_p4 = pnand %p1859_p3, %p1853_p0 }
   0xc   :  { %1863 = shalt.err (!%p1860_p4)
}
   0xd   :  { %s1953_s27 = smov 128   ;;  %s1954_s28 = smov 8  }
   0xe   :  { %37 = dma.hbm_to_vmem [thread:$0]  %s2033_s1, 14336, %s32_s25, [#allocation6], %s1953_s27, %s1953_s27, %s1954_s28  }
   0xf   :  { %s1955_s8 = smov [#allocation2]   ;;  %s1956_s10 = smov [#allocation7]  }
  0x10   :  { %s22_s9 = sshll.u32 %s1955_s8, 4  ;;  %s45_s11 = sshll.u32 %s1956_s10, 4  ;;  %s23_s9 = int_to_ptr.vmem [resolvable:$true] %s22_s9  ;;  %s46_s11 = int_to_ptr.vmem [resolvable:$true] %s45_s11 }
  0x11   :  { %s1872_s12 = scalar_lea.vmem %s23_s9, 448  ;;  %p1877_p6 = scmp.lt.s32.totalorder %s23_s9, %s23_s9 }
  0x12   :  { %p1873_p5 = scmp.ne.s32.totalorder %s23_s9, %s1872_s12  ;;  %p1878_p7 = scmp.lt.s32.totalorder %s1872_s12, %s1872_s12 }
  0x14   :  { %p1879_p8 = por %p1878_p7, %p1877_p6 }
  0x16   :  { %p1880_p9 = pnand %p1879_p8, %p1873_p5 }
  0x18   :  { %1883 = shalt.err (!%p1880_p9)
}
  0x19   :  { %25 = dma.hbm_to_vmem [thread:$0]  %s2032_s0, 448, %s23_s9, [#allocation3]  }
  0x1a   :  { %s1892_s15 = scalar_lea.vmem %s46_s11, 4096  ;;  %p1897_p11 = scmp.lt.s32.totalorder %s46_s11, %s46_s11 }
  0x1b   :  { %p1893_p10 = scmp.ne.s32.totalorder %s46_s11, %s1892_s15  ;;  %p1898_p12 = scmp.lt.s32.totalorder %s1892_s15, %s1892_s15 }
  0x1d   :  { %p1899_p13 = por %p1898_p12, %p1897_p11 }
  0x1f   :  { %p1900_p0 = pnand %p1899_p13, %p1893_p10 }
  0x21   :  { %1903 = shalt.err (!%p1900_p0)
}
  0x22   :  { %51 = dma.hbm_to_vmem [thread:$0]  %s2035_s3, 4096, %s46_s11, [#allocation6], %s1953_s27, %s1953_s27, %s1954_s28  }
  0x23   :  { %s1957_s17 = smov [#allocation8]  }
  0x24   :  { %s59_s18 = sshll.u32 %s1957_s17, 4  ;;  %s60_s18 = int_to_ptr.vmem [resolvable:$true] %s59_s18 }
  0x25   :  { %s1912_s19 = scalar_lea.vmem %s60_s18, 2048  ;;  %p1917_p2 = scmp.lt.s32.totalorder %s60_s18, %s60_s18 }
  0x26   :  { %p1913_p1 = scmp.ne.s32.totalorder %s60_s18, %s1912_s19  ;;  %p1918_p3 = scmp.lt.s32.totalorder %s1912_s19, %s1912_s19 }
  0x28   :  { %p1919_p4 = por %p1918_p3, %p1917_p2 }
  0x2a   :  { %p1920_p5 = pnand %p1919_p4, %p1913_p1 }
  0x2c   :  { %1923 = shalt.err (!%p1920_p5)
}
  0x2d   :  { %s1958_s0 = smov 64   ;;  %s1959_s20 = smov 4  }
  0x2e   :  { %65 = dma.hbm_to_vmem [thread:$0]  %s2037_s5, 2048, %s60_s18, [#allocation9], %s1958_s0, %s1958_s0, %s1959_s20  }
  0x2f   :  { %1944 = dma.done.wait [#allocation3], 448  }
  0x30   :  { %1945 = vsyncadd [#allocation3], 4294966848 }
  0x31   :  { %1946 = dma.done.wait [#allocation6], 18432  }
  0x32   :  { %1947 = vsyncadd [#allocation6], 4294948864 }
  0x33   :  { %1948 = dma.done.wait [#allocation9], 2048  }
  0x34   :  { %1949 = vsyncadd [#allocation9], 4294965248  ;;  %v1605_v0 = vld [vmem:[#allocation5 + $0x74] ss:$8 sps:$4 sm:$0xff]   ;;  %v1607_v1 = vld [vmem:[#allocation5 + $0x70] ss:$8 sps:$4 sm:$0xff]  }
  0x35   :  { %794 = vmatprep.subr.bf16.mxu0 %v1605_v0  ;;  %v1608_v2 = vld [vmem:[#allocation5 + $0x174] ss:$8 sps:$4 sm:$0xff]   ;;  %v1610_v3 = vld [vmem:[#allocation5 + $0x170] ss:$8 sps:$4 sm:$0xff]   ;;  %v1611_v4 = vld [vmem:[#allocation5 + $0x64] ss:$8 sps:$4 sm:$0xff]  }
  0x36   :  { %795 = vmatpush1.bf16.msra.mxu0 %v1607_v1  ;;  %v1613_v5 = vld [vmem:[#allocation5 + $0x60] ss:$8 sps:$4 sm:$0xff]   ;;  %835 = vmatprep.subr.bf16.mxu1 %v1608_v2  ;;  %v1614_v6 = vld [vmem:[#allocation5 + $0x164] ss:$8 sps:$4 sm:$0xff]   ;;  %v1617_v8 = vld [vmem:[#allocation5 + $0x54] ss:$8 sps:$4 sm:$0xff]  }
  0x37   :  { %836 = vmatpush1.bf16.msra.mxu1 %v1610_v3  ;;  %796 = vmatprep.subr.bf16.mxu0 %v1611_v4  ;;  %v1616_v7 = vld [vmem:[#allocation5 + $0x160] ss:$8 sps:$4 sm:$0xff]   ;;  %v1619_v9 = vld [vmem:[#allocation5 + $0x50] ss:$8 sps:$4 sm:$0xff]   ;;  %v1620_v10 = vld [vmem:[#allocation5 + $0x154] ss:$8 sps:$4 sm:$0xff]  }
  0x38   :  { %837 = vmatprep.subr.bf16.mxu1 %v1614_v6  ;;  %v1623_v11 = vld [vmem:[#allocation5 + $0x44] ss:$8 sps:$4 sm:$0xff]   ;;  %v1622_v12 = vld [vmem:[#allocation5 + $0x150] ss:$8 sps:$4 sm:$0xff]   ;;  %v1625_v14 = vld [vmem:[#allocation5 + $0x40] ss:$8 sps:$4 sm:$0xff]  }
  0x39   :  { %v1626_v13 = vld [vmem:[#allocation5 + $0x144] ss:$8 sps:$4 sm:$0xff]   ;;  %v1629_v15 = vld [vmem:[#allocation5 + $0x34] ss:$8 sps:$4 sm:$0xff]   ;;  %v1628_v16 = vld [vmem:[#allocation5 + $0x140] ss:$8 sps:$4 sm:$0xff]  }
  0x3a   :  { %797 = vmatpush1.bf16.msra.mxu0 %v1613_v5  ;;  %v1632_v17 = vld [vmem:[#allocation5 + $0x134] ss:$8 sps:$4 sm:$0xff]   ;;  %v1631_v18 = vld [vmem:[#allocation5 + $0x30] ss:$8 sps:$4 sm:$0xff]   ;;  %v1635_v19 = vld [vmem:[#allocation5 + $0x24] ss:$8 sps:$4 sm:$0xff]  }
  0x3b   :  { %798 = vmatprep.subr.bf16.mxu0 %v1617_v8  ;;  %838 = vmatpush1.bf16.msra.mxu1 %v1616_v7  ;;  %v1634_v20 = vld [vmem:[#allocation5 + $0x130] ss:$8 sps:$4 sm:$0xff]   ;;  %v1638_v21 = vld [vmem:[#allocation5 + $0x124] ss:$8 sps:$4 sm:$0xff]   ;;  %v1637_v22 = vld [vmem:[#allocation5 + $0x20] ss:$8 sps:$4 sm:$0xff]  }
  0x3c   :  { %839 = vmatprep.subr.bf16.mxu1 %v1620_v10  ;;  %v1641_v23 = vld [vmem:[#allocation5 + $0x14] ss:$8 sps:$4 sm:$0xff]   ;;  %v1640_v24 = vld [vmem:[#allocation5 + $0x120] ss:$8 sps:$4 sm:$0xff]   ;;  %v1643_v26 = vld [vmem:[#allocation5 + $0x10] ss:$8 sps:$4 sm:$0xff]  }
  0x3d   :  { %v1644_v25 = vld [vmem:[#allocation5 + $0x114] ss:$8 sps:$4 sm:$0xff]   ;;  %v1647_v27 = vld [vmem:[#allocation5 + $0x4] ss:$8 sps:$4 sm:$0xff]   ;;  %v1646_v28 = vld [vmem:[#allocation5 + $0x110] ss:$8 sps:$4 sm:$0xff]  }
  0x3e   :  { %799 = vmatpush1.bf16.msra.mxu0 %v1619_v9  ;;  %v1650_v29 = vld [vmem:[#allocation5 + $0x104] ss:$8 sps:$4 sm:$0xff]   ;;  %v1649_v30 = vld [vmem:[#allocation5] ss:$8 sps:$4 sm:$0xff]   ;;  %v1653_v31 = vld [vmem:[#allocation5 + $0xf4] ss:$8 sps:$4 sm:$0xff]  }
  0x3f   :  { %800 = vmatprep.subr.bf16.mxu0 %v1623_v11  ;;  %840 = vmatpush1.bf16.msra.mxu1 %v1622_v12  ;;  %v1652_v32 = vld [vmem:[#allocation5 + $0x100] ss:$8 sps:$4 sm:$0xff]   ;;  %v1656_v33 = vld [vmem:[#allocation5 + $0x1f4] ss:$8 sps:$4 sm:$0xff]   ;;  %v1655_v34 = vld [vmem:[#allocation5 + $0xf0] ss:$8 sps:$4 sm:$0xff]  }
  0x40   :  { %841 = vmatprep.subr.bf16.mxu1 %v1626_v13  ;;  %v1659_v35 = vld [vmem:[#allocation5 + $0xe4] ss:$8 sps:$4 sm:$0xff]   ;;  %v1658_v36 = vld [vmem:[#allocation5 + $0x1f0] ss:$8 sps:$4 sm:$0xff]   ;;  %v1661_v38 = vld [vmem:[#allocation5 + $0xe0] ss:$8 sps:$4 sm:$0xff]  }
  0x41   :  { %v1662_v37 = vld [vmem:[#allocation5 + $0x1e4] ss:$8 sps:$4 sm:$0xff]   ;;  %v1665_v39 = vld [vmem:[#allocation5 + $0xd4] ss:$8 sps:$4 sm:$0xff]   ;;  %v1664_v40 = vld [vmem:[#allocation5 + $0x1e0] ss:$8 sps:$4 sm:$0xff]  }
  0x42   :  { %801 = vmatpush1.bf16.msra.mxu0 %v1625_v14  ;;  %v1668_v41 = vld [vmem:[#allocation5 + $0x1d4] ss:$8 sps:$4 sm:$0xff]   ;;  %v1667_v42 = vld [vmem:[#allocation5 + $0xd0] ss:$8 sps:$4 sm:$0xff]   ;;  %v1671_v43 = vld [vmem:[#allocation5 + $0xc4] ss:$8 sps:$4 sm:$0xff]  }
  0x43   :  { %802 = vmatprep.subr.bf16.mxu0 %v1629_v15  ;;  %842 = vmatpush1.bf16.msra.mxu1 %v1628_v16  ;;  %v1670_v44 = vld [vmem:[#allocation5 + $0x1d0] ss:$8 sps:$4 sm:$0xff]   ;;  %v1674_v45 = vld [vmem:[#allocation5 + $0x1c4] ss:$8 sps:$4 sm:$0xff]   ;;  %v1673_v47 = vld [vmem:[#allocation5 + $0xc0] ss:$8 sps:$4 sm:$0xff]  }
  0x44   :  { %843 = vmatprep.subr.bf16.mxu1 %v1632_v17  ;;  %v81_v46 = vld [vmem:[#allocation2] sm:$0xff]  ;;  %v1677_v49 = vld [vmem:[#allocation5 + $0xb4] ss:$8 sps:$4 sm:$0xff]   ;;  %v82_v50 = vld [vmem:[#allocation2 + $0x8] sm:$0xff]  ;;  %v1960_v15 = vmov 0  }
  0x45   :  { %v1406_v48 = vcombine.high %v81_v46, %v81_v46  ;;  %v1676_v51 = vld [vmem:[#allocation5 + $0x1c0] ss:$8 sps:$4 sm:$0xff]   ;;  %v1408_v52 = vcombine.high %v82_v50, %v82_v50  ;;  %v1680_v53 = vld [vmem:[#allocation5 + $0x1b4] ss:$8 sps:$4 sm:$0xff]   ;;  %v1679_v54 = vld [vmem:[#allocation5 + $0xb0] ss:$8 sps:$4 sm:$0xff]   ;;  %v1405_v5 = vcombine.low %v81_v46, %v81_v46  ;;  %v1407_v8 = vcombine.low %v82_v50, %v82_v50 }
  0x46   :  { %803 = vmatpush1.bf16.msra.mxu0 %v1631_v18  ;;  %v1683_v55 = vld [vmem:[#allocation5 + $0xa4] ss:$8 sps:$4 sm:$0xff]   ;;  %v1682_v56 = vld [vmem:[#allocation5 + $0x1b0] ss:$8 sps:$4 sm:$0xff]   ;;  %v1685_v58 = vld [vmem:[#allocation5 + $0xa0] ss:$8 sps:$4 sm:$0xff]  }
  0x47   :  { %804 = vmatprep.subr.bf16.mxu0 %v1635_v19  ;;  %844 = vmatpush1.bf16.msra.mxu1 %v1634_v20  ;;  %v1686_v57 = vld [vmem:[#allocation5 + $0x1a4] ss:$8 sps:$4 sm:$0xff]   ;;  %v1689_v59 = vld [vmem:[#allocation5 + $0x94] ss:$8 sps:$4 sm:$0xff]   ;;  %v1688_v60 = vld [vmem:[#allocation5 + $0x1a0] ss:$8 sps:$4 sm:$0xff]  }
  0x48   :  { %845 = vmatprep.subr.bf16.mxu1 %v1638_v21  ;;  %826 = vmatprep.mubr.bf16.mxu0 %v1406_v48  ;;  %v1692_v61 = vld [vmem:[#allocation5 + $0x194] ss:$8 sps:$4 sm:$0xff]   ;;  %v1691_v62 = vld [vmem:[#allocation5 + $0x90] ss:$8 sps:$4 sm:$0xff]   ;;  %v1695_v63 = vld [vmem:[#allocation5 + $0x84] ss:$8 sps:$4 sm:$0xff]  }
  0x49   :  { %867 = vmatprep.mubr.bf16.mxu1 %v1408_v52  ;;  %v1694_v0 = vld [vmem:[#allocation5 + $0x190] ss:$8 sps:$4 sm:$0xff]   ;;  %v1698_v1 = vld [vmem:[#allocation5 + $0x184] ss:$8 sps:$4 sm:$0xff]   ;;  %v1697_v2 = vld [vmem:[#allocation5 + $0x80] ss:$8 sps:$4 sm:$0xff]  }
  0x4a   :  { %805 = vmatpush1.bf16.msra.mxu0 %v1637_v22  ;;  %v1705_v3 = vld [vmem:[#allocation5 + $0x274] ss:$8 sps:$4 sm:$0xff]   ;;  %v1702_v4 = vld [vmem:[#allocation5 + $0x180] ss:$8 sps:$4 sm:$0xff]   ;;  %v1703_v7 = vld [vmem:[#allocation5 + $0x270] ss:$8 sps:$4 sm:$0xff]  }
  0x4b   :  { %806 = vmatprep.subr.bf16.mxu0 %v1641_v23  ;;  %846 = vmatpush1.bf16.msra.mxu1 %v1640_v24  ;;  %v1731_v6 = vld [vmem:[#allocation5 + $0x374] ss:$8 sps:$4 sm:$0xff]   ;;  %v1710_v9 = vld [vmem:[#allocation5 + $0x264] ss:$8 sps:$4 sm:$0xff]   ;;  %v1729_v10 = vld [vmem:[#allocation5 + $0x370] ss:$8 sps:$4 sm:$0xff]  }
  0x4c   :  { %847 = vmatprep.subr.bf16.mxu1 %v1644_v25  ;;  %v1737_v11 = vld [vmem:[#allocation5 + $0x364] ss:$8 sps:$4 sm:$0xff]   ;;  %v1708_v12 = vld [vmem:[#allocation5 + $0x260] ss:$8 sps:$4 sm:$0xff]   ;;  %v1713_v13 = vld [vmem:[#allocation5 + $0x254] ss:$8 sps:$4 sm:$0xff]  }
  0x4d   :  { %v1735_v14 = vld [vmem:[#allocation5 + $0x360] ss:$8 sps:$4 sm:$0xff]   ;;  %v1743_v16 = vld [vmem:[#allocation5 + $0x354] ss:$8 sps:$4 sm:$0xff]   ;;  %v1711_v17 = vld [vmem:[#allocation5 + $0x250] ss:$8 sps:$4 sm:$0xff]  }
  0x4e   :  { %807 = vmatpush1.bf16.msra.mxu0 %v1643_v26  ;;  %v1716_v18 = vld [vmem:[#allocation5 + $0x244] ss:$8 sps:$4 sm:$0xff]   ;;  %v1714_v19 = vld [vmem:[#allocation5 + $0x240] ss:$8 sps:$4 sm:$0xff]   ;;  %v1741_v20 = vld [vmem:[#allocation5 + $0x350] ss:$8 sps:$4 sm:$0xff]  }
  0x4f   :  { %808 = vmatprep.subr.bf16.mxu0 %v1647_v27  ;;  %848 = vmatpush1.bf16.msra.mxu1 %v1646_v28  ;;  %v1749_v21 = vld [vmem:[#allocation5 + $0x344] ss:$8 sps:$4 sm:$0xff]   ;;  %v1719_v22 = vld [vmem:[#allocation5 + $0x234] ss:$8 sps:$4 sm:$0xff]   ;;  %v1747_v23 = vld [vmem:[#allocation5 + $0x340] ss:$8 sps:$4 sm:$0xff]  }
  0x50   :  { %849 = vmatprep.subr.bf16.mxu1 %v1650_v29  ;;  %v1755_v24 = vld [vmem:[#allocation5 + $0x334] ss:$8 sps:$4 sm:$0xff]   ;;  %v1717_v26 = vld [vmem:[#allocation5 + $0x230] ss:$8 sps:$4 sm:$0xff]   ;;  %v1722_v28 = vld [vmem:[#allocation5 + $0x224] ss:$8 sps:$4 sm:$0xff]  }
  0x51   :  { %v2014_v25 = vld [vmem:[#allocation2 + $0x10] sm:$0xff]  ;;  %v1752_v48 = vld [vmem:[#allocation5 + $0x2c4] ss:$8 sps:$4 sm:$0xff]  }
  0x52   :  { %809 = vmatpush1.bf16.msra.mxu0 %v1649_v30  ;;  %v1410_v27 = vcombine.high %v2014_v25, %v2014_v25  ;;  %v1753_v29 = vld [vmem:[#allocation5 + $0x330] ss:$8 sps:$4 sm:$0xff]   ;;  %v1761_v30 = vld [vmem:[#allocation5 + $0x324] ss:$8 sps:$4 sm:$0xff]   ;;  %v1746_v46 = vld [vmem:[#allocation5 + $0x2d4] ss:$8 sps:$4 sm:$0xff]  }
  0x53   :  { %810 = vmatprep.subr.bf16.mxu0 %v1653_v31  ;;  %850 = vmatpush1.bf16.msra.mxu1 %v1652_v32  ;;  %v1720_v31 = vld [vmem:[#allocation5 + $0x220] ss:$8 sps:$4 sm:$0xff]   ;;  %v1725_v32 = vld [vmem:[#allocation5 + $0x214] ss:$8 sps:$4 sm:$0xff]   ;;  %v1764_v52 = vld [vmem:[#allocation5 + $0x2a4] ss:$8 sps:$4 sm:$0xff]  }
  0x54   :  { %851 = vmatprep.subr.bf16.mxu1 %v1656_v33  ;;  %v1759_v33 = vld [vmem:[#allocation5 + $0x320] ss:$8 sps:$4 sm:$0xff]   ;;  %v1758_v50 = vld [vmem:[#allocation5 + $0x2b4] ss:$8 sps:$4 sm:$0xff]  }
  0x56   :  { %811 = vmatpush2.bf16.msra.mxu0 %v1655_v34  ;;  %v1767_v34 = vld [vmem:[#allocation5 + $0x314] ss:$8 sps:$4 sm:$0xff]  }
  0x57   :  { %812 = vmatprep.subr.bf16.mxu0 %v1659_v35  ;;  %852 = vmatpush2.bf16.msra.mxu1 %v1658_v36  ;;  %v1723_v35 = vld [vmem:[#allocation5 + $0x210] ss:$8 sps:$4 sm:$0xff]   ;;  %v1728_v36 = vld [vmem:[#allocation5 + $0x204] ss:$8 sps:$4 sm:$0xff]  }
  0x58   :  { %853 = vmatprep.subr.bf16.mxu1 %v1662_v37  ;;  %v1765_v37 = vld [vmem:[#allocation5 + $0x310] ss:$8 sps:$4 sm:$0xff]  }
  0x5a   :  { %813 = vmatpush2.bf16.msra.mxu0 %v1661_v38  ;;  %v1773_v38 = vld [vmem:[#allocation5 + $0x304] ss:$8 sps:$4 sm:$0xff]  }
  0x5b   :  { %814 = vmatprep.subr.bf16.mxu0 %v1665_v39  ;;  %854 = vmatpush2.bf16.msra.mxu1 %v1664_v40  ;;  %v1726_v39 = vld [vmem:[#allocation5 + $0x200] ss:$8 sps:$4 sm:$0xff]   ;;  %v1734_v40 = vld [vmem:[#allocation5 + $0x2f4] ss:$8 sps:$4 sm:$0xff]  }
  0x5c   :  { %855 = vmatprep.subr.bf16.mxu1 %v1668_v41  ;;  %v1771_v41 = vld [vmem:[#allocation5 + $0x300] ss:$8 sps:$4 sm:$0xff]  }
  0x5e   :  { %815 = vmatpush2.bf16.msra.mxu0 %v1667_v42  ;;  %v1732_v42 = vld [vmem:[#allocation5 + $0x2f0] ss:$8 sps:$4 sm:$0xff]  }
  0x5f   :  { %816 = vmatprep.subr.bf16.mxu0 %v1671_v43  ;;  %856 = vmatpush2.bf16.msra.mxu1 %v1670_v44  ;;  %v1740_v43 = vld [vmem:[#allocation5 + $0x2e4] ss:$8 sps:$4 sm:$0xff]   ;;  %v1777_v44 = vld [vmem:[#allocation2 + $0x18] ss:$0 sps:$4 sm:$0xff]  }
  0x60   :  { %857 = vmatprep.subr.bf16.mxu1 %v1674_v45  ;;  %v1738_v45 = vld [vmem:[#allocation5 + $0x2e0] ss:$8 sps:$4 sm:$0xff]  }
  0x62   :  { %817 = vmatpush2.bf16.msra.mxu0 %v1673_v47  ;;  %v1744_v47 = vld [vmem:[#allocation5 + $0x2d0] ss:$8 sps:$4 sm:$0xff]  }
  0x63   :  { %818 = vmatprep.subr.bf16.mxu0 %v1677_v49  ;;  %858 = vmatpush2.bf16.msra.mxu1 %v1676_v51  ;;  %v1750_v49 = vld [vmem:[#allocation5 + $0x2c0] ss:$8 sps:$4 sm:$0xff]   ;;  %v1756_v51 = vld [vmem:[#allocation5 + $0x2b0] ss:$8 sps:$4 sm:$0xff]  }
  0x64   :  { %859 = vmatprep.subr.bf16.mxu1 %v1680_v53  ;;  %v1762_v53 = vld [vmem:[#allocation5 + $0x2a0] ss:$8 sps:$4 sm:$0xff]  }
  0x66   :  { %819 = vmatpush2.bf16.msra.mxu0 %v1679_v54  ;;  %v1770_v54 = vld [vmem:[#allocation5 + $0x294] ss:$8 sps:$4 sm:$0xff]  }
  0x67   :  { %820 = vmatprep.subr.bf16.mxu0 %v1683_v55  ;;  %860 = vmatpush2.bf16.msra.mxu1 %v1682_v56  ;;  %v1768_v55 = vld [vmem:[#allocation5 + $0x290] ss:$8 sps:$4 sm:$0xff]   ;;  %v1776_v56 = vld [vmem:[#allocation5 + $0x284] ss:$8 sps:$4 sm:$0xff]  }
  0x68   :  { %861 = vmatprep.subr.bf16.mxu1 %v1686_v57  ;;  %v1774_v57 = vld [vmem:[#allocation5 + $0x280] ss:$8 sps:$4 sm:$0xff]  }
  0x6a   :  { %821 = vmatpush2.bf16.msra.mxu0 %v1685_v58  ;;  %v1409_v58 = vcombine.low %v2014_v25, %v2014_v25  ;;  %v1827_v25 = vld [vmem:[#allocation7 + $0x84] ss:$8 sps:$4 sm:$0xff]  }
  0x6b   :  { %822 = vmatprep.subr.bf16.mxu0 %v1689_v59  ;;  %862 = vmatpush2.bf16.msra.mxu1 %v1688_v60  ;;  %v1780_v59 = vld [vmem:[#allocation7 + $0x70] ss:$8 sps:$4 sm:$0xff]   ;;  %v1782_v60 = vld [vmem:[#allocation7 + $0x74] ss:$8 sps:$4 sm:$0xff]  }
  0x6c   :  { %863 = vmatprep.subr.bf16.mxu1 %v1692_v61  ;;  %v1785_v61 = vld [vmem:[#allocation7 + $0x64] ss:$8 sps:$4 sm:$0xff]  }
  0x6e   :  { %823 = vmatpush2.bf16.msra.mxu0 %v1691_v62  ;;  %v1783_v62 = vld [vmem:[#allocation7 + $0x60] ss:$8 sps:$4 sm:$0xff]  }
  0x6f   :  { %824 = vmatprep.subr.bf16.mxu0 %v1695_v63  ;;  %864 = vmatpush2.bf16.msra.mxu1 %v1694_v0  ;;  %v1788_v63 = vld [vmem:[#allocation7 + $0x54] ss:$8 sps:$4 sm:$0xff]   ;;  %v1786_v0 = vld [vmem:[#allocation7 + $0x50] ss:$8 sps:$4 sm:$0xff]  }
  0x70   :  { %865 = vmatprep.subr.bf16.mxu1 %v1698_v1  ;;  %v1791_v1 = vld [vmem:[#allocation7 + $0x44] ss:$8 sps:$4 sm:$0xff]  }
  0x72   :  { %825 = vmatpush2.bf16.msra.mxu0 %v1697_v2  ;;  %v1789_v2 = vld [vmem:[#allocation7 + $0x40] ss:$8 sps:$4 sm:$0xff]  }
  0x73   :  { %876 = vmatprep.subr.bf16.mxu0 %v1705_v3  ;;  %866 = vmatpush2.bf16.msra.mxu1 %v1702_v4  ;;  %v1794_v3 = vld [vmem:[#allocation7 + $0x34] ss:$8 sps:$4 sm:$0xff]   ;;  %v1792_v4 = vld [vmem:[#allocation7 + $0x30] ss:$8 sps:$4 sm:$0xff]  }
  0x74   :  { %917 = vmatprep.subr.bf16.mxu1 %v1731_v6  ;;  %v1795_v6 = vld [vmem:[#allocation7 + $0x20] ss:$8 sps:$4 sm:$0xff]  }
  0x75   :  { %827 = vmatmul.mubr.bf16.vlgmr.msra.gmra.mxu0 %v1405_v5  ;;  %v1797_v5 = vld [vmem:[#allocation7 + $0x24] ss:$8 sps:$4 sm:$0xff]  }
  0x76   :  { %877 = vmatpush1.bf16.msra.mxu0 %v1703_v7  ;;  %868 = vmatmul.mubr.bf16.vlgmr.msra.gmra.mxu1 %v1407_v8  ;;  %v1800_v7 = vld [vmem:[#allocation7 + $0x14] ss:$8 sps:$4 sm:$0xff]   ;;  %v1798_v8 = vld [vmem:[#allocation7 + $0x10] ss:$8 sps:$4 sm:$0xff]  }
  0x77   :  { %878 = vmatprep.subr.bf16.mxu0 %v1710_v9  ;;  %918 = vmatpush1.bf16.msra.mxu1 %v1729_v10  ;;  %v1803_v9 = vld [vmem:[#allocation7 + $0x4] ss:$8 sps:$4 sm:$0xff]   ;;  %v1801_v10 = vld [vmem:[#allocation7] ss:$8 sps:$4 sm:$0xff]  }
  0x78   :  { %949 = vmatprep.mubr.bf16.mxu1 %v1960_v15  ;;  %919 = vmatprep.subr.bf16.mxu1 %v1737_v11  ;;  %v1806_v11 = vld [vmem:[#allocation7 + $0xf4] ss:$8 sps:$4 sm:$0xff]  }
  0x79   :  { %908 = vmatprep.mubr.bf16.mxu0 %v1410_v27  ;;  %v1812_v15 = vld [vmem:[#allocation7 + $0xd4] ss:$8 sps:$4 sm:$0xff]  }
  0x7a   :  { %879 = vmatpush1.bf16.msra.mxu0 %v1708_v12  ;;  %v1804_v12 = vld [vmem:[#allocation7 + $0xf0] ss:$8 sps:$4 sm:$0xff]  }
  0x7b   :  { %880 = vmatprep.subr.bf16.mxu0 %v1713_v13  ;;  %920 = vmatpush1.bf16.msra.mxu1 %v1735_v14  ;;  %v1809_v13 = vld [vmem:[#allocation7 + $0xe4] ss:$8 sps:$4 sm:$0xff]   ;;  %v1807_v14 = vld [vmem:[#allocation7 + $0xe0] ss:$8 sps:$4 sm:$0xff]   ;;  %v1828_v27 = vld [vmem:[#allocation8 + $0x78] sm:$0xff]  }
  0x7c   :  { %921 = vmatprep.subr.bf16.mxu1 %v1743_v16  ;;  %v1810_v16 = vld [vmem:[#allocation7 + $0xd0] ss:$8 sps:$4 sm:$0xff]  }
  0x7e   :  { %881 = vmatpush1.bf16.msra.mxu0 %v1711_v17  ;;  %v1815_v17 = vld [vmem:[#allocation7 + $0xc4] ss:$8 sps:$4 sm:$0xff]  }
  0x7f   :  { %882 = vmatprep.subr.bf16.mxu0 %v1716_v18  ;;  %922 = vmatpush1.bf16.msra.mxu1 %v1741_v20  ;;  %v1813_v18 = vld [vmem:[#allocation7 + $0xc0] ss:$8 sps:$4 sm:$0xff]   ;;  %v1816_v20 = vld [vmem:[#allocation7 + $0xb0] ss:$8 sps:$4 sm:$0xff]  }
  0x80   :  { %923 = vmatprep.subr.bf16.mxu1 %v1749_v21  ;;  %v1821_v21 = vld [vmem:[#allocation7 + $0xa4] ss:$8 sps:$4 sm:$0xff]  }
  0x82   :  { %883 = vmatpush1.bf16.msra.mxu0 %v1714_v19  ;;  %v1818_v19 = vld [vmem:[#allocation7 + $0xb4] ss:$8 sps:$4 sm:$0xff]  }
  0x83   :  { %884 = vmatprep.subr.bf16.mxu0 %v1719_v22  ;;  %924 = vmatpush1.bf16.msra.mxu1 %v1747_v23  ;;  %v1819_v22 = vld [vmem:[#allocation7 + $0xa0] ss:$8 sps:$4 sm:$0xff]   ;;  %v1824_v23 = vld [vmem:[#allocation7 + $0x94] ss:$8 sps:$4 sm:$0xff]  }
  0x84   :  { %925 = vmatprep.subr.bf16.mxu1 %v1755_v24  ;;  %v1822_v24 = vld [vmem:[#allocation7 + $0x90] ss:$8 sps:$4 sm:$0xff]  }
  0x86   :  { %885 = vmatpush1.bf16.msra.mxu0 %v1717_v26  ;;  %v1825_v26 = vld [vmem:[#allocation7 + $0x80] ss:$8 sps:$4 sm:$0xff]  }
  0x87   :  { %886 = vmatprep.subr.bf16.mxu0 %v1722_v28  ;;  %926 = vmatpush1.bf16.msra.mxu1 %v1753_v29  ;;  %v1829_v28 = vld [vmem:[#allocation8 + $0x38] sm:$0xff]   ;;  %v1830_v29 = vld [vmem:[#allocation8 + $0x70] sm:$0xff]  }
  0x88   :  { %927 = vmatprep.subr.bf16.mxu1 %v1761_v30  ;;  %v1831_v30 = vld [vmem:[#allocation8 + $0x30] sm:$0xff]  }
  0x8a   :  { %887 = vmatpush1.bf16.msra.mxu0 %v1720_v31  ;;  %v1832_v31 = vld [vmem:[#allocation8 + $0x68] sm:$0xff]  }
  0x8b   :  { %888 = vmatprep.subr.bf16.mxu0 %v1725_v32  ;;  %928 = vmatpush1.bf16.msra.mxu1 %v1759_v33  ;;  %v1833_v32 = vld [vmem:[#allocation8 + $0x28] sm:$0xff]   ;;  %v1834_v33 = vld [vmem:[#allocation8 + $0x60] sm:$0xff]  }
  0x8c   :  { %929 = vmatprep.subr.bf16.mxu1 %v1767_v34  ;;  %v1835_v34 = vld [vmem:[#allocation8 + $0x20] sm:$0xff]  }
  0x8e   :  { %889 = vmatpush1.bf16.msra.mxu0 %v1723_v35  ;;  %v1836_v35 = vld [vmem:[#allocation8 + $0x58] sm:$0xff]  }
  0x8f   :  { %890 = vmatprep.subr.bf16.mxu0 %v1728_v36  ;;  %930 = vmatpush1.bf16.msra.mxu1 %v1765_v37  ;;  %v1837_v36 = vld [vmem:[#allocation8 + $0x18] sm:$0xff]   ;;  %v1838_v37 = vld [vmem:[#allocation8 + $0x50] sm:$0xff]  }
  0x90   :  { %931 = vmatprep.subr.bf16.mxu1 %v1773_v38  ;;  %v1839_v38 = vld [vmem:[#allocation8 + $0x10] sm:$0xff]  }
  0x92   :  { %891 = vmatpush1.bf16.msra.mxu0 %v1726_v39 }
  0x93   :  { %892 = vmatprep.subr.bf16.mxu0 %v1734_v40  ;;  %932 = vmatpush1.bf16.msra.mxu1 %v1771_v41 }
  0x94   :  { %1166 = vmatprep.subr.bf16.mxu1 %v1782_v60 }
  0x96   :  { %893 = vmatpush2.bf16.msra.mxu0 %v1732_v42  ;;  %950 = vmatmul.mubr.bf16.vlgmr.msra.gmra.mxu1 %v1777_v44 }
  0x97   :  { %894 = vmatprep.subr.bf16.mxu0 %v1740_v43  ;;  %1167 = vmatpush1.bf16.msra.mxu1 %v1780_v59 }
  0x98   :  { %1168 = vmatprep.subr.bf16.mxu1 %v1785_v61 }
  0x9a   :  { %895 = vmatpush2.bf16.msra.mxu0 %v1738_v45 }
  0x9b   :  { %896 = vmatprep.subr.bf16.mxu0 %v1746_v46  ;;  %1169 = vmatpush1.bf16.msra.mxu1 %v1783_v62 }
  0x9c   :  { %1170 = vmatprep.subr.bf16.mxu1 %v1788_v63 }
  0x9e   :  { %897 = vmatpush2.bf16.msra.mxu0 %v1744_v47 }
  0x9f   :  { %898 = vmatprep.subr.bf16.mxu0 %v1752_v48  ;;  %1171 = vmatpush1.bf16.msra.mxu1 %v1786_v0 }
  0xa0   :  { %1172 = vmatprep.subr.bf16.mxu1 %v1791_v1 }
  0xa2   :  { %899 = vmatpush2.bf16.msra.mxu0 %v1750_v49 }
  0xa3   :  { %900 = vmatprep.subr.bf16.mxu0 %v1758_v50  ;;  %1173 = vmatpush1.bf16.msra.mxu1 %v1789_v2 }
  0xa4   :  { %1174 = vmatprep.subr.bf16.mxu1 %v1794_v3 }
  0xa6   :  { %901 = vmatpush2.bf16.msra.mxu0 %v1756_v51  ;;  %v199_v51 = vlaneseq }
  0xa7   :  { %902 = vmatprep.subr.bf16.mxu0 %v1764_v52  ;;  %1175 = vmatpush1.bf16.msra.mxu1 %v1792_v4 }
  0xa8   :  { %1176 = vmatprep.subr.bf16.mxu1 %v1797_v5  ;;  %v200_v52 = vshrl.u32 %v199_v51, 7 }
  0xaa   :  { %903 = vmatpush2.bf16.msra.mxu0 %v1762_v53  ;;  %v201_v53 = vsub.s32 0, %v200_v52 }
  0xab   :  { %904 = vmatprep.subr.bf16.mxu0 %v1770_v54  ;;  %1177 = vmatpush1.bf16.msra.mxu1 %v1795_v6  ;;  %v197_v54 = vld [vmem:[%s2034_s2] sm:$0x3] }
  0xac   :  { %1178 = vmatprep.subr.bf16.mxu1 %v1800_v7 }
  0xae   :  { %905 = vmatpush2.bf16.msra.mxu0 %v1768_v55  ;;  %v205_v55 = vsub.s32 1, %v200_v52 }
  0xaf   :  { %906 = vmatprep.subr.bf16.mxu0 %v1776_v56  ;;  %1179 = vmatpush1.bf16.msra.mxu1 %v1798_v8  ;;  %v202_v56 = vrot.slane %v197_v54, %v201_v53 }
  0xb0   :  { %1180 = vmatprep.subr.bf16.mxu1 %v1803_v9 }
  0xb2   :  { %907 = vmatpush2.bf16.msra.mxu0 %v1774_v57  ;;  %v206_v57 = vrot.slane %v197_v54, %v205_v55 }
  0xb3   :  { %1181 = vmatpush1.bf16.msra.mxu1 %v1801_v10  ;;  %1573 = vmatprep.subr.bf16.mxu0 %v1828_v27  ;;  %v1840_v10 = vld [vmem:[#allocation8 + $0x48] sm:$0xff]  }
  0xb4   :  { %1182 = vmatprep.subr.bf16.mxu1 %v1806_v11  ;;  %v1841_v11 = vld [vmem:[#allocation8 + $0x8] sm:$0xff]  }
  0xb5   :  { %909 = vmatmul.mubr.bf16.vlgmr.msra.gmra.mxu0 %v1409_v58 }
  0xb6   :  { %1574 = vmatpush3.bf16.msra.mxu0 %v1829_v28  ;;  %v1556_v28 = vld [vmem:[%s2038_s6] ss:$0 sm:$0xff] }
  0xb7   :  { %1183 = vmatpush2.bf16.msra.mxu1 %v1804_v12  ;;  %1575 = vmatprep.subr.bf16.mxu0 %v1830_v29  ;;  %v1842_v12 = vld [vmem:[#allocation8 + $0x40] sm:$0xff]  }
  0xb8   :  { %1184 = vmatprep.subr.bf16.mxu1 %v1809_v13  ;;  %v1843_v13 = vld [vmem:[#allocation8] sm:$0xff]  }
  0xba   :  { %1576 = vmatpush3.bf16.msra.mxu0 %v1831_v30 }
  0xbb   :  { %1185 = vmatpush2.bf16.msra.mxu1 %v1807_v14  ;;  %1577 = vmatprep.subr.bf16.mxu0 %v1832_v31  ;;  %v994_v14 = vld [vmem:[%s2036_s4] sm:$0x3]  ;;  %s1961_s4 = smov [#allocation10]  }
  0xbc   :  { %1186 = vmatprep.subr.bf16.mxu1 %v1812_v15  ;;  %v999_v15 = vrot.slane %v994_v14, %v201_v53  ;;  %s1394_s26 = sshll.u32 %s1961_s4, 4  ;;  %s1395_s26 = int_to_ptr.vmem [resolvable:$true] %s1394_s26 }
  0xbd   :  { %s1924_s27 = scalar_lea.vmem %s1395_s26, 128  ;;  %p1929_p7 = scmp.lt.s32.totalorder %s1395_s26, %s1395_s26 }
  0xbe   :  { %1578 = vmatpush3.bf16.msra.mxu0 %v1833_v32  ;;  %p1925_p6 = scmp.ne.s32.totalorder %s1395_s26, %s1924_s27  ;;  %p1930_p8 = scmp.lt.s32.totalorder %s1924_s27, %s1924_s27 }
  0xbf   :  { %1187 = vmatpush2.bf16.msra.mxu1 %v1810_v16  ;;  %1579 = vmatprep.subr.bf16.mxu0 %v1834_v33  ;;  %v1003_v16 = vrot.slane %v994_v14, %v205_v55 }
  0xc0   :  { %1188 = vmatprep.subr.bf16.mxu1 %v1815_v17  ;;  %p1931_p9 = por %p1930_p8, %p1929_p7 }
  0xc2   :  { %1580 = vmatpush3.bf16.msra.mxu0 %v1835_v34  ;;  %p1932_p10 = pnand %p1931_p9, %p1925_p6 }
  0xc3   :  { %1189 = vmatpush2.bf16.msra.mxu1 %v1813_v18  ;;  %1581 = vmatprep.subr.bf16.mxu0 %v1836_v35 }
  0xc4   :  { %1190 = vmatprep.subr.bf16.mxu1 %v1818_v19 }
  0xc6   :  { %1582 = vmatpush3.bf16.msra.mxu0 %v1837_v36 }
  0xc7   :  { %1191 = vmatpush2.bf16.msra.mxu1 %v1816_v20  ;;  %1583 = vmatprep.subr.bf16.mxu0 %v1838_v37 }
  0xc8   :  { %1192 = vmatprep.subr.bf16.mxu1 %v1821_v21 }
  0xca   :  { %1584 = vmatpush3.bf16.msra.mxu0 %v1839_v38 }
  0xcb   :  { %1193 = vmatpush2.bf16.msra.mxu1 %v1819_v22  ;;  %1585 = vmatprep.subr.bf16.mxu0 %v1840_v10 }
  0xcc   :  { %1194 = vmatprep.subr.bf16.mxu1 %v1824_v23 }
  0xce   :  { %1586 = vmatpush3.bf16.msra.mxu0 %v1841_v11 }
  0xcf   :  { %1195 = vmatpush2.bf16.msra.mxu1 %v1822_v24  ;;  %1587 = vmatprep.subr.bf16.mxu0 %v1842_v12 }
  0xd0   :  { %1196 = vmatprep.subr.bf16.mxu1 %v1827_v25 }
  0xd2   :  { %1588 = vmatpush3.bf16.msra.mxu0 %v1843_v13 }
  0xd3   :  { %1197 = vmatpush2.bf16.msra.mxu1 %v1825_v26 }
 0x135   :  { %v828_v39 = vpop.f32.mrf.mxu0 }
 0x136   :  { %v869_v41 = vpop.f32.mrf.mxu1  ;;  %v829_v58 = vadd.f32 %v828_v39, %v202_v56 }
 0x137   :  { %v830_v40 = vpop.f32.mrf.mxu0 }
 0x138   :  { %v871_v43 = vpop.f32.mrf.mxu1  ;;  %v831_v59 = vadd.f32 %v830_v40, %v206_v57  ;;  %v870_v60 = vadd.f32 %v869_v41, %v829_v58 }
 0x139   :  { %v832_v42 = vpop.f32.mrf.mxu0 }
 0x13a   :  { %v873_v45 = vpop.f32.mrf.mxu1  ;;  %v872_v62 = vadd.f32 %v871_v43, %v831_v59 }
 0x13b   :  { %v833_v44 = vpop.f32.mrf.mxu0 }
 0x13c   :  { %v874_v46 = vpop.f32.mrf.mxu1 }
 0x156   :  { %v951_v47 = vpop.f32.mrf.mxu1 }
 0x158   :  { %v953_v48 = vpop.f32.mrf.mxu1 }
 0x15a   :  { %v955_v49 = vpop.f32.mrf.mxu1 }
 0x15c   :  { %v956_v50 = vpop.f32.mrf.mxu1 }
 0x175   :  { %v910_v61 = vpop.f32.mrf.mxu0 }
 0x176   :  { %v911_v63 = vadd.f32 %v910_v61, %v870_v60 }
 0x177   :  { %v912_v0 = vpop.f32.mrf.mxu0 }
 0x178   :  { %v952_v1 = vadd.f32 %v951_v47, %v911_v63  ;;  %v913_v2 = vadd.f32 %v912_v0, %v872_v62 }
 0x179   :  { %v914_v3 = vpop.f32.mrf.mxu0 }
 0x17a   :  { %v954_v4 = vadd.f32 %v953_v48, %v913_v2  ;;  %v958_v5 = vmax.f32 %v952_v1, 0.0 }
 0x17b   :  { %v915_v6 = vpop.f32.mrf.mxu0 }
 0x17c   :  { %v959_v7 = vmax.f32 %v954_v4, 0.0  ;;  %v960_v9 = vpack.c.bf16 %v958_v5, %v958_v5 }
 0x17e   :  { %v961_v8 = vpack.c.bf16 %v959_v7, %v959_v7 }
 0x180   :  { %1198 = vmatprep.mubr.bf16.mxu1 %v961_v8 }
 0x181   :  { %1199 = vmatmul.mubr.bf16.vlgmr.msra.gmra.mxu1 %v960_v9 }
 0x241   :  { %v1200_v17 = vpop.f32.mrf.mxu1 }
 0x242   :  { %v1201_v18 = vadd.f32 %v1200_v17, %v999_v15 }
 0x243   :  { %v1202_v19 = vpop.f32.mrf.mxu1 }
 0x244   :  { %v1203_v20 = vadd.f32 %v1202_v19, %v1003_v16  ;;  %v1207_v21 = vmax.f32 %v1201_v18, 0.0 }
 0x245   :  { %v1204_v22 = vpop.f32.mrf.mxu1 }
 0x246   :  { %v1208_v23 = vmax.f32 %v1203_v20, 0.0  ;;  %v1209_v26 = vpack.c.bf16 %v1207_v21, %v1207_v21 }
 0x247   :  { %v1205_v24 = vpop.f32.mrf.mxu1 }
 0x248   :  { %v1210_v25 = vpack.c.bf16 %v1208_v23, %v1208_v23 }
 0x24a   :  { %1378 = vmatprep.mubr.bf16.mxu0 %v1210_v25 }
 0x24b   :  { %1379 = vmatmul.mubr.bf16.vlgmr.msra.gmra.mxu0 %v1209_v26 }
 0x30b   :  { %v1589_v27 = vpop.f32.mrf.mxu0 }
 0x30d   :  { %v1590_v29 = vpop.f32.mrf.mxu0 }
 0x30e   :  { %v1591_v30 = vadd.f32 %v1590_v29, %v1589_v27 }
 0x30f   :  { %v1592_v31 = vpop.f32.mrf.mxu0 }
 0x310   :  { %v1381_v32 = vadd.f32 %v1591_v30, %v1556_v28 }
 0x311   :  { %v1593_v33 = vpop.f32.mrf.mxu0 }
 0x312   :  { %v1386_v34 = vmax.f32 %v1381_v32, 0.0 }
 0x314   :  { %1387 = vst [vmem:[#allocation10] sm:$0xff] %v1386_v34 }
 0x315   :  { %1935 = shalt.err (!%p1932_p10)
}
 0x316   :  { %1397 = dma.vmem_to_hbm [thread:$0]  %s1395_s26, 128, %s2039_s7, [#allocation4]  }
 0x317   :  { %1950 = dma.done.wait [#allocation4], 128  }
 0x318   :  { %1951 = vsyncadd [#allocation4], 4294967168 }
 0x319   :  { %1401 = vsyncpa [#allocation3], 1 }
 0x31a   :  { %1402 = vsyncpa [#allocation6], 1 }
 0x31b   :  { %1403 = vsyncpa [#allocation9], 1 }
 0x31c   :  { %1404 = vsyncpa [#allocation4], 1 }

</bundles_post_ra>
